<compile_context>
chip_gen: v7x
topology: tpu7x:2x2x1
jax: 0.10.0
libtpu: 0.0.40
codegen_flags: <defaults>
</compile_context>

<pallas_src>
import jax
import jax.numpy as jnp
from jax.experimental import pallas as pl
from jax.experimental.pallas import tpu as pltpu


def se_kernel(x_ref, w1_ref, b1_ref, w2_ref, b2_ref, o_ref):
    # x_ref: (N, C, HWp) — channels on sublanes, spatial positions on lanes.
    x = x_ref[...]                                  # native dtype
    n, c, hwp = x.shape

    # ---- Squeeze: global average pool over HW, done on the MXU -------------
    # (N*C, HWp) @ (HWp, 1) -> (N*C, 1) with f32 accumulation.  Padded lanes
    # of x are zero so they do not perturb the sum; the 1/HW mean factor is
    # pre-folded into w1, keeping this a pure sum (no extra VPU multiply).
    x2 = x.reshape(n * c, hwp)                      # leading-dim collapse
    ones_col = jnp.ones((hwp, 1), dtype=x.dtype)
    s = jnp.dot(x2, ones_col, preferred_element_type=jnp.float32)  # (N*C, 1)
    s = s.reshape(n, c)                             # tiny (N*C-scalar) relayout

    # ---- Excitation: fc1 -> relu -> fc2 -> sigmoid, all in f32 -------------
    h = jnp.dot(s, w1_ref[...], preferred_element_type=jnp.float32) + b1_ref[...]
    h = jnp.maximum(h, 0.0)                         # (N, Cr)
    g = jnp.dot(h, w2_ref[...], preferred_element_type=jnp.float32) + b2_ref[...]
    g = jax.nn.sigmoid(g)                           # (N, C), f32 (EUP)

    # ---- Scale: channel-wise gate, in the input's native dtype -------------
    o_ref[...] = x * g.astype(x.dtype)[:, :, None]


def prepare_se_params(w1, b1, w2, b2, spatial_size):
    """One-time (module-init) parameter prep — keep out of the hot path.

    w1: (Cr, C) and w2: (C, Cr) in torch nn.Linear (out, in) layout.
    Returns (w1_t_scaled, b1_row, w2_t, b2_row) with the 1/HW mean factor of
    the global average pool folded into the fc1 weight.
    """
    Cr, C = w1.shape
    inv_hw = 1.0 / float(spatial_size)
    w1_t = (jnp.transpose(w1).astype(jnp.float32)) * inv_hw   # (C, Cr), absorbs mean
    b1_r = b1.reshape(1, Cr).astype(jnp.float32)
    w2_t = jnp.transpose(w2).astype(jnp.float32)               # (Cr, C)
    b2_r = b2.reshape(1, C).astype(jnp.float32)
    return w1_t, b1_r, w2_t, b2_r


def se_opt_forward(x_nchw, params, *, donate_input=False):
    """x_nchw: (N, C, H, W); params from prepare_se_params (done once)."""
    N, C, H, W = x_nchw.shape
    HW = H * W
    w1_t, b1_r, w2_t, b2_r = params
    Cr = w1_t.shape[1]

    # Lane-dense output: pad the spatial axis up to a multiple of 128 so the
    # store path is unmasked vst.  No-op for HW already a multiple of 128.
    HWp = ((HW + 127) // 128) * 128
    x_flat = x_nchw.reshape(N, C, HW)               # free, contiguous reshape
    if HWp != HW:
        x_flat = jnp.pad(x_flat, ((0, 0), (0, 0), (0, HWp - HW)))

    itemsize = jnp.dtype(x_nchw.dtype).itemsize
    flops = 2 * N * C * HWp + 2 * N * C * Cr + 2 * N * Cr * C + N * C * HWp
    bytes_accessed = 2 * N * C * HWp * itemsize + (2 * C * Cr + Cr + C) * 4

    vmem_spec = pl.BlockSpec(memory_space=pltpu.MemorySpace.VMEM)

    out = pl.pallas_call(
        se_kernel,
        out_shape=jax.ShapeDtypeStruct((N, C, HWp), x_nchw.dtype),
        in_specs=[vmem_spec] * 5,                    # all operands VMEM-resident
        out_specs=vmem_spec,
        # SE is an in-place channel scale: alias x -> out when the caller can
        # donate x (saves the output HBM allocation).  Off by default here
        # because the test reuses x afterwards.
        input_output_aliases=({0: 0} if donate_input else {}),
        cost_estimate=pl.CostEstimate(
            flops=flops, transcendentals=N * C, bytes_accessed=bytes_accessed),
        # 32 MiB scoped VMEM is ample here and stays safe on v7x (64 MiB
        # physical); on v5e/v6e larger future tiles could go up to ~100 MiB.
        compiler_params=pltpu.CompilerParams(vmem_limit_bytes=32 * 1024 * 1024),
    )(x_flat, w1_t, b1_r, w2_t, b2_r)

    if HWp != HW:
        out = out[:, :, :HW]
    return out.reshape(N, C, H, W)                  # free reshape back to NCHW


def se_opt_reference(x_nchw, w1, b1, w2, b2):
    """Pure-JAX reference mirroring the torch forward exactly."""
    s = jnp.mean(x_nchw, axis=(2, 3))               # AdaptiveAvgPool2d((1,1)) + flatten
    s = s @ w1.T + b1                               # fc1
    s = jnp.maximum(s, 0.0)                         # relu
    s = s @ w2.T + b2                               # fc2
    s = jax.nn.sigmoid(s)                           # sigmoid
    s = s[:, :, None, None]                         # view (N, C, 1, 1)
    return x_nchw * s                               # channel-wise scale


if __name__ == "__main__":
    # Module config: inplanes=32, reduction=8 -> reduced_planes=4
    N, C, H, W = 2, 32, 16, 16
    reduction = 8
    Cr = C // reduction

    key = jax.random.PRNGKey(0)
    kx, kw1, kb1, kw2, kb2 = jax.random.split(key, 5)

    x = jax.random.normal(kx, (N, C, H, W), dtype=jnp.float32)
    # Deterministic synthetic parameters (torch nn.Linear layout: (out, in)).
    w1 = jax.random.normal(kw1, (Cr, C), dtype=jnp.float32) * 0.1
    b1 = jax.random.normal(kb1, (Cr,), dtype=jnp.float32) * 0.1
    w2 = jax.random.normal(kw2, (C, Cr), dtype=jnp.float32) * 0.1
    b2 = jax.random.normal(kb2, (C,), dtype=jnp.float32) * 0.1

    # One-time parameter prep (module init time, not per forward call).
    params = prepare_se_params(w1, b1, w2, b2, spatial_size=H * W)

    out = se_opt_forward(x, params)
    out = jax.block_until_ready(out)

    ref = se_opt_reference(x, w1, b1, w2, b2)
    assert out.shape == (N, C, H, W)
    assert jnp.allclose(out, ref, atol=1e-5, rtol=1e-5), "mismatch vs reference"

    print("KERNEL_OK")
</pallas_src>

<mosaic_0001>
module attributes {stable_mosaic.version = 11 : i64} {
  func.func @se_kernel(%arg0: memref<2x32x256xf32, #tpu.memory_space<vmem>>, %arg1: memref<32x4xf32, #tpu.memory_space<vmem>>, %arg2: memref<1x4xf32, #tpu.memory_space<vmem>>, %arg3: memref<4x32xf32, #tpu.memory_space<vmem>>, %arg4: memref<1x32xf32, #tpu.memory_space<vmem>>, %arg5: memref<2x32x256xf32, #tpu.memory_space<vmem>>) attributes {dimension_semantics = [], scalar_prefetch = 0 : i64, scratch_operands = 0 : i64, tpu.core_type = #tpu.core_type<tc>} {
    %c0 = arith.constant 0 : index
    %c0_0 = arith.constant 0 : index
    %c0_1 = arith.constant 0 : index
    %0 = vector.load %arg0[%c0, %c0_0, %c0_1] : memref<2x32x256xf32, #tpu.memory_space<vmem>>, vector<2x32x256xf32>
    %1 = vector.shape_cast %0 : vector<2x32x256xf32> to vector<64x256xf32>
    %cst = arith.constant 1.000000e+00 : f32
    %2 = vector.broadcast %cst : f32 to vector<256x1xf32>
    %cst_2 = arith.constant dense<0.000000e+00> : vector<64x1xf32>
    %3 = tpu.matmul %1, %2, %cst_2 {dimension_numbers = #tpu.dot_dimension_numbers<[1], [0], [0], [1], [0, 0, 1, 1], [], []>} : vector<64x256xf32>, vector<256x1xf32>, vector<64x1xf32> -> vector<64x1xf32>
    %4 = vector.shape_cast %3 : vector<64x1xf32> to vector<2x32xf32>
    %c0_3 = arith.constant 0 : index
    %c0_4 = arith.constant 0 : index
    %5 = vector.load %arg1[%c0_3, %c0_4] : memref<32x4xf32, #tpu.memory_space<vmem>>, vector<32x4xf32>
    %cst_5 = arith.constant dense<0.000000e+00> : vector<2x4xf32>
    %6 = tpu.matmul %4, %5, %cst_5 {dimension_numbers = #tpu.dot_dimension_numbers<[1], [0], [0], [1], [0, 0, 1, 1], [], []>} : vector<2x32xf32>, vector<32x4xf32>, vector<2x4xf32> -> vector<2x4xf32>
    %c0_6 = arith.constant 0 : index
    %c0_7 = arith.constant 0 : index
    %7 = vector.load %arg2[%c0_6, %c0_7] : memref<1x4xf32, #tpu.memory_space<vmem>>, vector<1x4xf32>
    %8 = vector.broadcast %7 : vector<1x4xf32> to vector<2x4xf32>
    %9 = arith.addf %6, %8 : vector<2x4xf32>
    %cst_8 = arith.constant 0.000000e+00 : f32
    %10 = vector.broadcast %cst_8 : f32 to vector<2x4xf32>
    %11 = arith.maximumf %9, %10 : vector<2x4xf32>
    %c0_9 = arith.constant 0 : index
    %c0_10 = arith.constant 0 : index
    %12 = vector.load %arg3[%c0_9, %c0_10] : memref<4x32xf32, #tpu.memory_space<vmem>>, vector<4x32xf32>
    %cst_11 = arith.constant dense<0.000000e+00> : vector<2x32xf32>
    %13 = tpu.matmul %11, %12, %cst_11 {dimension_numbers = #tpu.dot_dimension_numbers<[1], [0], [0], [1], [0, 0, 1, 1], [], []>} : vector<2x4xf32>, vector<4x32xf32>, vector<2x32xf32> -> vector<2x32xf32>
    %c0_12 = arith.constant 0 : index
    %c0_13 = arith.constant 0 : index
    %14 = vector.load %arg4[%c0_12, %c0_13] : memref<1x32xf32, #tpu.memory_space<vmem>>, vector<1x32xf32>
    %15 = vector.broadcast %14 : vector<1x32xf32> to vector<2x32xf32>
    %16 = arith.addf %13, %15 : vector<2x32xf32>
    %17 = arith.negf %16 : vector<2x32xf32>
    %18 = math.exp %17 : vector<2x32xf32>
    %cst_14 = arith.constant 1.000000e+00 : f32
    %19 = vector.broadcast %cst_14 : f32 to vector<2x32xf32>
    %20 = arith.addf %19, %18 : vector<2x32xf32>
    %21 = arith.divf %19, %20 : vector<2x32xf32>
    %22 = vector.shape_cast %21 : vector<2x32xf32> to vector<2x32x1xf32>
    %23 = vector.broadcast %22 : vector<2x32x1xf32> to vector<2x32x256xf32>
    %24 = arith.mulf %0, %23 : vector<2x32x256xf32>
    %c0_15 = arith.constant 0 : index
    %c0_16 = arith.constant 0 : index
    %c0_17 = arith.constant 0 : index
    %25 = vector.load %arg5[%c0_15, %c0_16, %c0_17] : memref<2x32x256xf32, #tpu.memory_space<vmem>>, vector<2x32x256xf32>
    tpu.vector_store %arg5[%c0_15, %c0_16, %c0_17], %24 {strides = array<i32>} : memref<2x32x256xf32, #tpu.memory_space<vmem>>, vector<2x32x256xf32>,
    return
  }
}

</mosaic_0001>

<bundles_post_ra>
// kernel: tpu_custom_call.1
= control target key start
LH: loop header
LB: loop body
LE: loop exit
PB: predicated region body
PF: predicated region fallthrough
CT: control target
= control target key end

     0   :  { %10 = vsyncpa [#allocation3], 0  ;;  %s842_s0 = inlined_call_operand.hbm [shape: f32[2,32,256], index: 0, kind: input, shape index: {}]   ;;  %s843_s1 = inlined_call_operand.vmem [shape: f32[32,4], index: 1, kind: input, shape index: {}]   ;;  %s844_s2 = inlined_call_operand.vmem [shape: f32[1,4], index: 2, kind: input, shape index: {}]   ;;  %s845_s3 = inlined_call_operand.vmem [shape: f32[4,32], index: 3, kind: input, shape index: {}]   ;;  %s846_s4 = inlined_call_operand.vmem [shape: f32[1,32], index: 4, kind: input, shape index: {}]   ;;  %s847_s5 = inlined_call_operand.hbm [shape: f32[2,32,256], index: 5, kind: output, shape index: {}]  }
   0x1   :  { %11 = vsyncpa [#allocation4], 0  ;;  %s686_s18 = smov [#allocation2]   ;;  %s638_s22 = scalar_lea.hbm %s842_s0, 2048 }
   0x2   :  { %s17_s19 = sshll.u32 %s686_s18, 4  ;;  %p639_p0 = scmp.ne.s32.totalorder %s842_s0, %s638_s22  ;;  %s18_s19 = int_to_ptr.vmem [resolvable:$true] %s17_s19 }
   0x3   :  { %p642_p1 = scmp.lt.u32.totalorder %s638_s22, %s842_s0 }
   0x5   :  { %p644_p2 = pnand %p642_p1, %p639_p0 }
   0x7   :  { %647 = shalt.err (!%p644_p2)
}
   0x8   :  { %s648_s27 = scalar_lea.vmem %s18_s19, 2048  ;;  %p653_p4 = scmp.lt.s32.totalorder %s18_s19, %s18_s19 }
   0x9   :  { %p649_p3 = scmp.ne.s32.totalorder %s18_s19, %s648_s27  ;;  %p654_p5 = scmp.lt.s32.totalorder %s648_s27, %s648_s27 }
   0xb   :  { %p655_p6 = por %p654_p5, %p653_p4 }
   0xd   :  { %p656_p7 = pnand %p655_p6, %p649_p3 }
   0xf   :  { %659 = shalt.err (!%p656_p7)
}
  0x10   :  { %s687_s28 = smov 256   ;;  %s688_s29 = smov 16  }
  0x11   :  { %23 = dma.hbm_to_vmem [thread:$0]  %s842_s0, 2048, %s18_s19, [#allocation3], %s687_s28, %s687_s28, %s688_s29  }
  0x12   :  { %682 = dma.done.wait [#allocation3], 2048  }
  0x13   :  { %683 = vsyncadd [#allocation3], 4294965248  ;;  %v689_v0 = vmov 1.0|1.0   ;;  %v740_v1 = vld [vmem:[#allocation2 + $0x8] sm:$0xff]  ;;  %v743_v2 = vld [vmem:[#allocation2 + $0x58] sm:$0xff]  ;;  %v199_v51 = vlaneseq }
  0x14   :  { %585 = vmatprep.subr.bf16.mxu0 %v689_v0  ;;  %607 = vmatprep.subr.bf16.mxu1 %v689_v0  ;;  %v746_v3 = vld [vmem:[#allocation2] sm:$0xff]  ;;  %v748_v4 = vld [vmem:[#allocation2 + $0x50] sm:$0xff]  ;;  %v750_v5 = vld [vmem:[#allocation2 + $0x18] sm:$0xff]  ;;  %v690_v17 = vmov 0   ;;  %v691_v39 = vmov 0.0|0.0   ;;  %vm692_vm0 = vmmov 0  }
  0x15   :  { %586 = vmatpush3.bf16.msra.mxu0 %v689_v0  ;;  %615 = vmatpush3.bf16.msra.mxu1 %v689_v0  ;;  %v752_v6 = vld [vmem:[#allocation2 + $0x68] sm:$0xff]  ;;  %v757_v7 = vld [vmem:[#allocation2 + $0x10] sm:$0xff]  ;;  %v760_v8 = vld [vmem:[#allocation2 + $0x60] sm:$0xff]  ;;  %v693_v49 = vmov 0.0   ;;  %v200_v54 = vand.u32 127, %v199_v51  ;;  %v202_v58 = vshrl.u32 %v199_v51, 7 }
  0x16   :  { %587 = vmatprep.subr.bf16.mxu0 %v689_v0  ;;  %608 = vmatprep.subr.bf16.mxu1 %v689_v0  ;;  %v762_v9 = vld [vmem:[#allocation2 + $0x28] sm:$0xff]  ;;  %v764_v10 = vld [vmem:[#allocation2 + $0x78] sm:$0xff]  ;;  %v769_v11 = vld [vmem:[#allocation2 + $0x20] sm:$0xff]  ;;  %vm210_vm1 = vcmask 130112   ;;  %vm217_vm2 = vcmask 195712   ;;  %vm224_vm3 = vcmask 261312  }
  0x17   :  { %115 = vmatprep.mubr.f32.mxu0 %v740_v1  ;;  %140 = vmatprep.mubr.f32.mxu1 %v743_v2  ;;  %v772_v12 = vld [vmem:[#allocation2 + $0x70] sm:$0xff]  ;;  %v774_v13 = vld [vmem:[#allocation2 + $0x38] sm:$0xff]  ;;  %v781_v15 = vld [vmem:[#allocation2 + $0x48] sm:$0xff]  ;;  %v205_v55 = vadd.s32 4294967288, %v200_v54  ;;  %v212_v56 = vadd.s32 4294967280, %v200_v54  ;;  %v219_v59 = vadd.s32 4294967272, %v200_v54  ;;  %v203_v63 = vsub.s32 %v200_v54, %v202_v58 }
  0x18   :  { %v779_v14 = vld [vmem:[#allocation2 + $0x30] sm:$0xff]  ;;  %v785_v16 = vld [vmem:[#allocation2 + $0x40] sm:$0xff]  ;;  %632 = vset.pattern.permute.xlu0 %v690_v17  ;;  %633 = vset.pattern.permute.xlu1 %v690_v17  ;;  %v157_v44 = vld [vmem:[%s843_s1 + $0x8] sm:$0xff]  ;;  %vm245_vm4 = vcmask 1041409   ;;  %vm247_vm5 = vcmask 261120   ;;  %vm333_vm6 = vcmask 1043456  }
  0x19   :  { %588 = vmatpush3.bf16.msra.mxu0 %v689_v0  ;;  %616 = vmatpush3.bf16.msra.mxu1 %v689_v0  ;;  %v156_v43 = vld [vmem:[%s843_s1] sm:$0xff]  ;;  %v158_v46 = vld [vmem:[%s843_s1 + $0x10] sm:$0xff]  ;;  %v159_v47 = vld [vmem:[%s843_s1 + $0x18] sm:$0xff]  ;;  %v208_v61 = vsub.s32 %v205_v55, %v202_v58  ;;  %v215_v62 = vsub.s32 %v212_v56, %v202_v58  ;;  %vm329_vm7 = vcmask 31744   ;;  %v434_v51 = vsub.s32 1, %v202_v58 }
  0x1a   :  { %589 = vmatprep.subr.bf16.mxu0 %v689_v0  ;;  %609 = vmatprep.subr.bf16.mxu1 %v689_v0  ;;  %v602_v45 = vpack.c.bf16 %v157_v44, %v156_v43  ;;  %v605_v48 = vpack.c.bf16 %v159_v47, %v158_v46 }
  0x1d   :  { %590 = vmatpush3.bf16.msra.mxu0 %v689_v0  ;;  %617 = vmatpush3.bf16.msra.mxu1 %v689_v0 }
  0x1e   :  { %591 = vmatprep.subr.bf16.mxu0 %v689_v0  ;;  %610 = vmatprep.subr.bf16.mxu1 %v689_v0 }
  0x21   :  { %592 = vmatpush3.bf16.msra.mxu0 %v689_v0  ;;  %618 = vmatpush3.bf16.msra.mxu1 %v689_v0 }
  0x22   :  { %593 = vmatprep.subr.bf16.mxu0 %v689_v0  ;;  %611 = vmatprep.subr.bf16.mxu1 %v689_v0 }
  0x25   :  { %594 = vmatpush3.bf16.msra.mxu0 %v689_v0  ;;  %619 = vmatpush3.bf16.msra.mxu1 %v689_v0 }
  0x26   :  { %595 = vmatprep.subr.bf16.mxu0 %v689_v0  ;;  %612 = vmatprep.subr.bf16.mxu1 %v689_v0 }
  0x29   :  { %596 = vmatpush3.bf16.msra.mxu0 %v689_v0  ;;  %620 = vmatpush3.bf16.msra.mxu1 %v689_v0 }
  0x2a   :  { %597 = vmatprep.subr.bf16.mxu0 %v689_v0  ;;  %613 = vmatprep.subr.bf16.mxu1 %v689_v0 }
  0x2d   :  { %598 = vmatpush3.bf16.msra.mxu0 %v689_v0  ;;  %621 = vmatpush3.bf16.msra.mxu1 %v689_v0 }
  0x2e   :  { %599 = vmatprep.subr.bf16.mxu0 %v689_v0  ;;  %614 = vmatprep.subr.bf16.mxu1 %v689_v0 }
  0x31   :  { %600 = vmatpush3.bf16.msra.mxu0 %v689_v0  ;;  %622 = vmatpush3.bf16.msra.mxu1 %v689_v0  ;;  %v222_v0 = vsub.s32 %v219_v59, %v202_v58 }
  0x32   :  { %601 = vmatprep.subr.bf16.mxu1 %v691_v39 }
  0x34   :  { %116 = vmatmul.mubr.f32.vlgmr.msra.gmra.mrb[0].mxu0 %v746_v3  ;;  %141 = vmatmul.mubr.f32.vlgmr.msra.gmra.mrb[0].mxu1 %v748_v4 }
  0x35   :  { %120 = vmatprep.mubr.f32.mxu0 %v750_v5  ;;  %145 = vmatprep.mubr.f32.mxu1 %v752_v6 }
  0x36   :  { %603 = vmatpush3.bf16.msra.mxu1 %v602_v45 }
  0x37   :  { %604 = vmatprep.subr.bf16.mxu1 %v691_v39 }
  0x38   :  { %121 = vmatmul.mubr.f32.gmra.mrb[2].mxu0 %v757_v7  ;;  %146 = vmatmul.mubr.f32.gmra.mrb[2].mxu1 %v760_v8 }
  0x39   :  { %125 = vmatprep.mubr.f32.mxu0 %v762_v9  ;;  %150 = vmatprep.mubr.f32.mxu1 %v764_v10 }
  0x3a   :  { %606 = vmatpush3.bf16.msra.mxu1 %v605_v48  ;;  %v415_v48 = vsub.s32 0, %v202_v58 }
  0x3b   :  { %580 = vmatprep.subr.mxu1 %v693_v49 }
  0x3c   :  { %126 = vmatmul.mubr.f32.gmra.mrb[4].mxu0 %v769_v11  ;;  %151 = vmatmul.mubr.f32.gmra.mrb[4].mxu1 %v772_v12 }
  0x3d   :  { %130 = vmatprep.mubr.f32.mxu0 %v774_v13  ;;  %577 = vmatprep.mubr.msk.f32.mxu1 %vm692_vm0, %v693_v49 }
  0x40   :  { %131 = vmatmul.mubr.f32.gmra.mrb[6].mxu0 %v779_v14 }
  0x41   :  { %135 = vmatprep.mubr.f32.mxu0 %v781_v15 }
  0x44   :  { %136 = vmatmul.mubr.f32.gmra.mrb[8].mxu0 %v785_v16 }
 0x107   :  { %v538_v18 = vpop.f32.mrb[0].mxu0  ;;  %v553_v19 = vpop.f32.mrb[0].mxu1 }
 0x108   :  { %v539_v20 = vpop.f32.mrb[1].mxu0  ;;  %v554_v21 = vpop.f32.mrb[1].mxu1 }
 0x109   :  { %v540_v22 = vadd.f32 %v539_v20, %v538_v18  ;;  %v555_v23 = vadd.f32 %v554_v21, %v553_v19 }
 0x10b   :  { %v541_v24 = vpop.f32.mrb[2].mxu0  ;;  %176 = vperm.xlu0 %632, %v540_v22   ;;  %v556_v25 = vpop.f32.mrb[2].mxu1  ;;  %191 = vperm.xlu1 %633, %v555_v23  }
 0x10c   :  { %v542_v26 = vpop.f32.mrb[3].mxu0  ;;  %v557_v27 = vpop.f32.mrb[3].mxu1 }
 0x10d   :  { %v543_v28 = vadd.f32 %v542_v26, %v541_v24  ;;  %v558_v29 = vadd.f32 %v557_v27, %v556_v25 }
 0x10f   :  { %v544_v30 = vpop.f32.mrb[4].mxu0  ;;  %179 = vperm.xlu0 %632, %v543_v28   ;;  %194 = vperm.xlu1 %633, %v558_v29   ;;  %v559_v31 = vpop.f32.mrb[4].mxu1 }
 0x110   :  { %v545_v32 = vpop.f32.mrb[5].mxu0  ;;  %v560_v33 = vpop.f32.mrb[5].mxu1 }
 0x111   :  { %v546_v34 = vadd.f32 %v545_v32, %v544_v30  ;;  %v561_v35 = vadd.f32 %v560_v33, %v559_v31 }
 0x113   :  { %v547_v36 = vpop.f32.mrb[6].mxu0  ;;  %182 = vperm.xlu0 %632, %v546_v34  }
 0x114   :  { %v548_v37 = vpop.f32.mrb[7].mxu0 }
 0x115   :  { %v549_v38 = vadd.f32 %v548_v37, %v547_v36  ;;  %v500_v36 = vld [vmem:[%s844_s2] ss:$0 sm:$0xff]  ;;  %s694_s2 = smov [#allocation5]  }
 0x117   :  { %v550_v40 = vpop.f32.mrb[8].mxu0  ;;  %185 = vperm.xlu0 %632, %v549_v38  }
 0x118   :  { %v551_v41 = vpop.f32.mrb[9].mxu0 }
 0x119   :  { %v552_v42 = vadd.f32 %v551_v41, %v550_v40  ;;  %v502_v41 = vld [vmem:[%s846_s4] ss:$0 sm:$0xff] }
 0x11b   :  { %188 = vperm.xlu1 %633, %v552_v42  }
 0x11f   :  { %197 = vperm.xlu1 %633, %v561_v35   ;;  %v321_v35 = vld [vmem:[%s845_s3] sm:$0xf]  ;;  %s488_s3 = sshll.u32 %s694_s2, 4  ;;  %s489_s3 = int_to_ptr.vmem [resolvable:$true] %s488_s3 }
 0x120   :  { %s660_s4 = scalar_lea.vmem %s489_s3, 2048  ;;  %p665_p9 = scmp.lt.s32.totalorder %s489_s3, %s489_s3 }
 0x121   :  { %p661_p8 = scmp.ne.s32.totalorder %s489_s3, %s660_s4  ;;  %p666_p10 = scmp.lt.s32.totalorder %s660_s4, %s660_s4 }
 0x123   :  { %p667_p11 = por %p666_p10, %p665_p9 }
 0x125   :  { %p668_p12 = pnand %p667_p11, %p661_p8 }
 0x18a   :  { %v177_v50 = vpop.permute.xlu0 %176  ;;  %v192_v53 = vpop.permute.xlu1 %191 }
 0x18b   :  { %v233_v19 = vrot.slane %v192_v53, %v208_v61  ;;  %v204_v23 = vrot.slane %v177_v50, %v203_v63 }
 0x18e   :  { %v180_v52 = vpop.permute.xlu0 %179  ;;  %v195_v60 = vpop.permute.xlu1 %194 }
 0x18f   :  { %v209_v20 = vrot.slane %v180_v52, %v208_v61  ;;  %v238_v26 = vrot.slane %v195_v60, %v215_v62 }
 0x191   :  { %v211_v28 = vsel %vm210_vm1, %v209_v20, %v204_v23 }
 0x192   :  { %v183_v57 = vpop.permute.xlu0 %182 }
 0x193   :  { %v216_v22 = vrot.slane %v183_v57, %v215_v62 }
 0x195   :  { %v218_v30 = vsel %vm217_vm2, %v216_v22, %v211_v28 }
 0x196   :  { %v186_v17 = vpop.permute.xlu0 %185 }
 0x197   :  { %v223_v24 = vrot.slane %v186_v17, %v222_v0 }
 0x199   :  { %v225_v32 = vsel %vm224_vm3, %v223_v24, %v218_v30 }
 0x19a   :  { %v189_v18 = vpop.permute.xlu1 %188 }
 0x19b   :  { %v229_v21 = vrot.slane %v189_v18, %v203_v63 }
 0x19d   :  { %v234_v25 = vsel %vm210_vm1, %v233_v19, %v229_v21 }
 0x19e   :  { %v198_v27 = vpop.permute.xlu1 %197  ;;  %v239_v31 = vsel %vm217_vm2, %v238_v26, %v234_v25 }
 0x19f   :  { %v243_v29 = vrot.slane %v198_v27, %v222_v0 }
 0x1a1   :  { %v244_v33 = vsel %vm224_vm3, %v243_v29, %v239_v31 }
 0x1a2   :  { %v246_v34 = vsel %vm245_vm4, %v244_v33, %v225_v32 }
 0x1a3   :  { %578 = vmatmul.mubr.msk.f32.vlgmr.msra.gmra.mrb[6].mxu1 %vm247_vm5, %v246_v34 }
 0x1a4   :  { %582 = vmatprep.mubr.msk.f32.mxu1 %vm692_vm0, %v693_v49  ;;  %581 = vmatpush3.msk.msra.mxu1 %vm333_vm6, %v321_v35 }
 0x276   :  { %v316_v37 = vpop.f32.mrb[6].mxu1 }
 0x277   :  { %v317_v38 = vadd.f32 %v500_v36, %v316_v37  ;;  %v579_v39 = vpop.f32.mrb[7].mxu1 }
 0x279   :  { %v320_v40 = vmax.f32 %v317_v38, 0.0 }
 0x27b   :  { %583 = vmatmul.mubr.msk.f32.vlgmr.msra.gmra.mrb[8].mxu1 %vm329_vm7, %v320_v40 }
 0x34e   :  { %v403_v42 = vpop.f32.mrb[8].mxu1 }
 0x34f   :  { %v404_v43 = vadd.f32 %v502_v41, %v403_v42  ;;  %v584_v44 = vpop.f32.mrb[9].mxu1 }
 0x351   :  { %v505_v45 = vmul.f32 -1.442695, %v404_v43 }
 0x353   :  { %634 = vpow2.f32 %v505_v45 }
 0x35d   :  { %v635_v46 = vpop.eup %634 }
 0x35e   :  { %v410_v47 = vadd.f32 1.0, %v635_v46 }
 0x360   :  { %636 = vrcp.f32 %v410_v47 }
 0x36a   :  { %v637_v49 = vpop.eup %636 }
 0x36b   :  { %v416_v50 = vrot.slane %v637_v49, %v415_v48  ;;  %v435_v52 = vrot.slane %v637_v49, %v434_v51 }
 0x36d   :  { %422 = vbcast.lane.b32.xlu1 %v416_v50, 264  ;;  %418 = vbcast.lane.b32.xlu0 %v416_v50, 256 }
 0x371   :  { %430 = vbcast.lane.b32.xlu1 %v416_v50, 280  ;;  %426 = vbcast.lane.b32.xlu0 %v416_v50, 272 }
 0x375   :  { %441 = vbcast.lane.b32.xlu1 %v435_v52, 264  ;;  %437 = vbcast.lane.b32.xlu0 %v435_v52, 256 }
 0x379   :  { %449 = vbcast.lane.b32.xlu1 %v435_v52, 280  ;;  %445 = vbcast.lane.b32.xlu0 %v435_v52, 272 }
 0x3df   :  { %v423_v53 = vpop.permute.xlu1 %422  ;;  %v419_v54 = vpop.permute.xlu0 %418 }
 0x3e0   :  { %v453_v55 = vmul.f32 %v423_v53, %v757_v7  ;;  %v454_v56 = vmul.f32 %v423_v53, %v750_v5  ;;  %v451_v57 = vmul.f32 %v419_v54, %v746_v3  ;;  %v452_v59 = vmul.f32 %v419_v54, %v740_v1 }
 0x3e2   :  { %469 = vst [vmem:[#allocation5 + $0x10] sm:$0xff] %v453_v55  ;;  %470 = vst [vmem:[#allocation5 + $0x18] sm:$0xff] %v454_v56 }
 0x3e3   :  { %467 = vst [vmem:[#allocation5] sm:$0xff] %v451_v57  ;;  %468 = vst [vmem:[#allocation5 + $0x8] sm:$0xff] %v452_v59  ;;  %v431_v58 = vpop.permute.xlu1 %430  ;;  %v427_v60 = vpop.permute.xlu0 %426 }
 0x3e4   :  { %v457_v61 = vmul.f32 %v431_v58, %v779_v14  ;;  %v458_v62 = vmul.f32 %v431_v58, %v774_v13  ;;  %v455_v63 = vmul.f32 %v427_v60, %v769_v11  ;;  %v456_v7 = vmul.f32 %v427_v60, %v762_v9 }
 0x3e6   :  { %473 = vst [vmem:[#allocation5 + $0x30] sm:$0xff] %v457_v61  ;;  %474 = vst [vmem:[#allocation5 + $0x38] sm:$0xff] %v458_v62 }
 0x3e7   :  { %471 = vst [vmem:[#allocation5 + $0x20] sm:$0xff] %v455_v63  ;;  %472 = vst [vmem:[#allocation5 + $0x28] sm:$0xff] %v456_v7  ;;  %v442_v3 = vpop.permute.xlu1 %441  ;;  %v438_v1 = vpop.permute.xlu0 %437 }
 0x3e8   :  { %v461_v5 = vmul.f32 %v442_v3, %v748_v4  ;;  %v462_v0 = vmul.f32 %v442_v3, %v743_v2  ;;  %v459_v17 = vmul.f32 %v438_v1, %v785_v16  ;;  %v460_v14 = vmul.f32 %v438_v1, %v781_v15 }
 0x3ea   :  { %477 = vst [vmem:[#allocation5 + $0x50] sm:$0xff] %v461_v5  ;;  %478 = vst [vmem:[#allocation5 + $0x58] sm:$0xff] %v462_v0 }
 0x3eb   :  { %475 = vst [vmem:[#allocation5 + $0x40] sm:$0xff] %v459_v17  ;;  %476 = vst [vmem:[#allocation5 + $0x48] sm:$0xff] %v460_v14  ;;  %v450_v9 = vpop.permute.xlu1 %449  ;;  %v446_v11 = vpop.permute.xlu0 %445 }
 0x3ec   :  { %v465_v13 = vmul.f32 %v450_v9, %v772_v12  ;;  %v466_v18 = vmul.f32 %v450_v9, %v764_v10  ;;  %v463_v4 = vmul.f32 %v446_v11, %v760_v8  ;;  %v464_v2 = vmul.f32 %v446_v11, %v752_v6 }
 0x3ee   :  { %481 = vst [vmem:[#allocation5 + $0x70] sm:$0xff] %v465_v13  ;;  %482 = vst [vmem:[#allocation5 + $0x78] sm:$0xff] %v466_v18 }
 0x3ef   :  { %479 = vst [vmem:[#allocation5 + $0x60] sm:$0xff] %v463_v4  ;;  %480 = vst [vmem:[#allocation5 + $0x68] sm:$0xff] %v464_v2 }
 0x3f0   :  { %671 = shalt.err (!%p668_p12)
}
 0x3f1   :  { %s672_s21 = scalar_lea.hbm %s847_s5, 2048 }
 0x3f2   :  { %p673_p13 = scmp.ne.s32.totalorder %s847_s5, %s672_s21  ;;  %p676_p0 = scmp.lt.u32.totalorder %s672_s21, %s847_s5 }
 0x3f4   :  { %p678_p1 = pnand %p676_p0, %p673_p13 }
 0x3f6   :  { %681 = shalt.err (!%p678_p1)
}
 0x3f7   :  { %494 = dma.vmem_to_hbm [thread:$0]  %s489_s3, 2048, %s847_s5, [#allocation4], %s687_s28, %s687_s28, %s688_s29  }
 0x3f8   :  { %684 = dma.done.wait [#allocation4], 2048  }
 0x3f9   :  { %685 = vsyncadd [#allocation4], 4294965248 }
 0x3fa   :  { %498 = vsyncpa [#allocation3], 1 }
 0x3fb   :  { %499 = vsyncpa [#allocation4], 1 }

</bundles_post_ra>
